<compile_context>
chip_gen: v5e
topology: v5e:2x2
jax: 0.10.0
libtpu: 0.0.40
codegen_flags: <defaults>
</compile_context>

<pallas_src>
import functools
import math

import jax
import jax.numpy as jnp
from jax.experimental import pallas as pl
from jax.experimental.pallas import tpu as pltpu


def _mc_integral_kernel(logits_ref, tgt_ref, out_ref, l_acc, m_acc, r_acc, *,
                        num_samples, num_tiles):
    """Grid = (B, S, T); b outermost (parallel), s middle, t innermost.

    logits_ref : (1, 1, C, THW) tile of samples (S, B, C, HW)
    tgt_ref    : (1, C, THW)    tile of one-hot target (B, C, HW)
    out_ref    : (1, 1, 128)    per-batch output block of (B, 1, 128)
    l_acc      : (1, 128) f32   partial voxel-sum of current sample's log-prob
    m_acc/r_acc: (1, 128) f32   online logsumexp state over the sample axis
    """
    s = pl.program_id(1)
    t = pl.program_id(2)

    # ---- per-batch init (scratch persists across s/t; reset at first step) ----
    @pl.when(jnp.logical_and(s == 0, t == 0))
    def _():
        m_acc[...] = jnp.full(m_acc.shape, -1e30, dtype=jnp.float32)
        r_acc[...] = jnp.zeros(r_acc.shape, dtype=jnp.float32)

    @pl.when(t == 0)
    def _():
        l_acc[...] = jnp.zeros(l_acc.shape, dtype=jnp.float32)

    # ---- per-voxel cross-entropy log prob of the target class ----
    x = logits_ref[0, 0]      # (C, THW)
    tg = tgt_ref[0]           # (C, THW) one-hot

    m_c = jnp.max(x, axis=0, keepdims=True)                                # (1, THW)
    lse_c = m_c + jnp.log(jnp.sum(jnp.exp(x - m_c), axis=0, keepdims=True))
    tl = jnp.sum(tg * x, axis=0, keepdims=True)                            # (1, THW)
    logp = tl - lse_c                                                      # (1, THW)

    # accumulate this tile's voxel sum for the current sample
    l_acc[...] = l_acc[...] + jnp.sum(logp, axis=-1, keepdims=True)

    # ---- sample finished: fold into online logsumexp over the sample axis ----
    @pl.when(t == num_tiles - 1)
    def _():
        L = l_acc[...]
        m_old = m_acc[...]
        m_new = jnp.maximum(m_old, L)
        r_acc[...] = r_acc[...] * jnp.exp(m_old - m_new) + jnp.exp(L - m_new)
        m_acc[...] = m_new

    # ---- all samples done for this batch element: write per-batch result ----
    @pl.when(jnp.logical_and(s == num_samples - 1, t == num_tiles - 1))
    def _():
        lse = m_acc[...] + jnp.log(r_acc[...])            # (1, 128), lanes equal
        val = lse - math.log(num_samples)
        out_ref[...] = jnp.broadcast_to(val, out_ref.shape)


def ssn_mc_integral_loss_from_samples(samples, target, *, hw_tile=None):
    """samples: (S, B, C, *spatial) float logits, target: (B, *spatial) int labels.
    Returns the scalar loss of the PyTorch module."""
    S, B, C = samples.shape[:3]
    assert C >= 2
    HW = 1
    for d in samples.shape[3:]:
        HW *= d

    logits = samples.reshape(S, B, C, HW).astype(jnp.float32)
    tgt = target.reshape(B, HW)
    onehot = jax.nn.one_hot(tgt, C, axis=1, dtype=jnp.float32)   # (B, C, HW)

    # HW tile: full HW if small, otherwise a lane-aligned tile that divides HW.
    if hw_tile is None:
        hw_tile = HW if HW <= 4096 else 4096
    if hw_tile != HW and (HW % hw_tile != 0 or hw_tile % 128 != 0):
        hw_tile = HW
    num_tiles = HW // hw_tile

    kernel = functools.partial(
        _mc_integral_kernel, num_samples=S, num_tiles=num_tiles)

    out = pl.pallas_call(
        kernel,
        out_shape=jax.ShapeDtypeStruct((B, 1, 128), jnp.float32),
        grid_spec=pltpu.PrefetchScalarGridSpec(
            num_scalar_prefetch=0,
            grid=(B, S, num_tiles),
            in_specs=[
                # stream one (C, hw_tile) logit tile of one MC sample per step
                pl.BlockSpec((1, 1, C, hw_tile), lambda b, s, t: (s, b, 0, t)),
                # matching one-hot target tile (grid-invariant in s)
                pl.BlockSpec((1, C, hw_tile), lambda b, s, t: (b, 0, t)),
            ],
            out_specs=pl.BlockSpec((1, 1, 128), lambda b, s, t: (b, 0, 0)),
            scratch_shapes=[
                pltpu.VMEM((1, 128), jnp.float32),   # per-sample voxel-sum acc
                pltpu.VMEM((1, 128), jnp.float32),   # online logsumexp running max
                pltpu.VMEM((1, 128), jnp.float32),   # online logsumexp running sum
            ],
        ),
        compiler_params=pltpu.CompilerParams(
            dimension_semantics=("parallel", "arbitrary", "arbitrary"),
        ),
    )(logits, onehot)

    per_batch = out[:, 0, 0]          # logsumexp_s L[s, b] - log(S), shape (B,)
    loglikelihood = jnp.mean(per_batch)
    return -loglikelihood / HW


def ssn_mc_loss_reference(samples, target):
    """Pure-JAX reference matching the PyTorch module."""
    S, B, C = samples.shape[:3]
    logits = samples.reshape(S, B, C, -1).astype(jnp.float32)
    n_vox = logits.shape[-1]
    tgt = target.reshape(B, -1)

    logp_all = jax.nn.log_softmax(logits, axis=2)                 # (S, B, C, HW)
    onehot = jax.nn.one_hot(tgt, C, axis=1, dtype=jnp.float32)    # (B, C, HW)
    logp = jnp.sum(logp_all * onehot[None], axis=2)               # (S, B, HW)
    L = jnp.sum(logp, axis=-1)                                    # (S, B)

    m = jnp.max(L, axis=0)
    lse = m + jnp.log(jnp.sum(jnp.exp(L - m), axis=0))            # (B,)
    loglikelihood = jnp.mean(lse - math.log(S))
    return -loglikelihood / n_vox


if __name__ == "__main__":
    S, B, C, H, W = 8, 2, 4, 16, 16    # MC samples, batch, classes, spatial

    key = jax.random.PRNGKey(0)
    k_s, k_t = jax.random.split(key)
    samples = jax.random.normal(k_s, (S, B, C, H, W), dtype=jnp.float32)
    target = jax.random.randint(k_t, (B, H, W), 0, C, dtype=jnp.int32)

    # hw_tile=128 -> 2 HW tiles: exercises the tiled partial-sum path.
    out = ssn_mc_integral_loss_from_samples(samples, target, hw_tile=128)
    out = jax.block_until_ready(out)

    ref = ssn_mc_loss_reference(samples, target)
    ref = jax.block_until_ready(ref)

    assert jnp.isfinite(out), "kernel produced non-finite loss"
    assert abs(float(out) - float(ref)) < 2e-3, (float(out), float(ref))
    print("KERNEL_OK")
</pallas_src>

<mosaic_0001>
module attributes {stable_mosaic.version = 11 : i64} {
  func.func @_mc_integral_kernel(%arg0: i32, %arg1: i32, %arg2: i32, %arg3: memref<1x1x4x128xf32, #tpu.memory_space<vmem>>, %arg4: memref<1x4x128xf32, #tpu.memory_space<vmem>>, %arg5: memref<1x1x128xf32, #tpu.memory_space<vmem>>, %arg6: memref<1x128xf32, #tpu.memory_space<vmem>>, %arg7: memref<1x128xf32, #tpu.memory_space<vmem>>, %arg8: memref<1x128xf32, #tpu.memory_space<vmem>>) attributes {dimension_semantics = [#tpu.dimension_semantics<parallel>, #tpu.dimension_semantics<arbitrary>, #tpu.dimension_semantics<arbitrary>], iteration_bounds = array<i64: 2, 8, 2>, scalar_prefetch = 0 : i64, scratch_operands = 3 : i64, tpu.core_type = #tpu.core_type<tc>, window_params = [{transform_indices = @transform_0, window_bounds = array<i64: 1, 1, 4, 128>}, {transform_indices = @transform_1, window_bounds = array<i64: 1, 4, 128>}, {transform_indices = @transform_2, window_bounds = array<i64: 1, 1, 128>}]} {
    %c0_i32 = arith.constant 0 : i32
    %0 = arith.cmpi eq, %arg1, %c0_i32 : i32
    %c0_i32_0 = arith.constant 0 : i32
    %1 = arith.cmpi eq, %arg2, %c0_i32_0 : i32
    %2 = arith.andi %0, %1 : i1
    %3 = arith.extui %2 : i1 to i32
    %c0_i32_1 = arith.constant 0 : i32
    %4 = arith.cmpi ne, %3, %c0_i32_1 : i32
    scf.if %4 {
      %cst_20 = arith.constant -1.000000e+30 : f32
      %39 = vector.broadcast %cst_20 : f32 to vector<1x128xf32>
      %c0_21 = arith.constant 0 : index
      %c0_22 = arith.constant 0 : index
      %40 = vector.load %arg7[%c0_21, %c0_22] : memref<1x128xf32, #tpu.memory_space<vmem>>, vector<1x128xf32>
      tpu.vector_store %arg7[%c0_21, %c0_22], %39 {strides = array<i32>} : memref<1x128xf32, #tpu.memory_space<vmem>>, vector<1x128xf32>,
      %cst_23 = arith.constant 0.000000e+00 : f32
      %41 = vector.broadcast %cst_23 : f32 to vector<1x128xf32>
      %c0_24 = arith.constant 0 : index
      %c0_25 = arith.constant 0 : index
      %42 = vector.load %arg8[%c0_24, %c0_25] : memref<1x128xf32, #tpu.memory_space<vmem>>, vector<1x128xf32>
      tpu.vector_store %arg8[%c0_24, %c0_25], %41 {strides = array<i32>} : memref<1x128xf32, #tpu.memory_space<vmem>>, vector<1x128xf32>,
    } else {
    }
    %c0_i32_2 = arith.constant 0 : i32
    %5 = arith.cmpi eq, %arg2, %c0_i32_2 : i32
    %6 = arith.extui %5 : i1 to i32
    %c0_i32_3 = arith.constant 0 : i32
    %7 = arith.cmpi ne, %6, %c0_i32_3 : i32
    scf.if %7 {
      %cst_20 = arith.constant 0.000000e+00 : f32
      %39 = vector.broadcast %cst_20 : f32 to vector<1x128xf32>
      %c0_21 = arith.constant 0 : index
      %c0_22 = arith.constant 0 : index
      %40 = vector.load %arg6[%c0_21, %c0_22] : memref<1x128xf32, #tpu.memory_space<vmem>>, vector<1x128xf32>
      tpu.vector_store %arg6[%c0_21, %c0_22], %39 {strides = array<i32>} : memref<1x128xf32, #tpu.memory_space<vmem>>, vector<1x128xf32>,
    } else {
    }
    %c0 = arith.constant 0 : index
    %c0_4 = arith.constant 0 : index
    %c0_5 = arith.constant 0 : index
    %c0_6 = arith.constant 0 : index
    %8 = vector.load %arg3[%c0, %c0_4, %c0_5, %c0_6] : memref<1x1x4x128xf32, #tpu.memory_space<vmem>>, vector<1x1x4x128xf32>
    %9 = vector.shape_cast %8 : vector<1x1x4x128xf32> to vector<4x128xf32>
    %c0_7 = arith.constant 0 : index
    %c0_8 = arith.constant 0 : index
    %c0_9 = arith.constant 0 : index
    %10 = vector.load %arg4[%c0_7, %c0_8, %c0_9] : memref<1x4x128xf32, #tpu.memory_space<vmem>>, vector<1x4x128xf32>
    %11 = vector.shape_cast %10 : vector<1x4x128xf32> to vector<4x128xf32>
    %cst = arith.constant dense<0xFF800000> : vector<128xf32>
    %12 = vector.multi_reduction <maximumf>, %9, %cst [0] : vector<4x128xf32> to vector<128xf32>
    %13 = vector.shape_cast %12 : vector<128xf32> to vector<1x128xf32>
    %14 = vector.broadcast %13 : vector<1x128xf32> to vector<4x128xf32>
    %15 = arith.subf %9, %14 : vector<4x128xf32>
    %16 = math.exp %15 : vector<4x128xf32>
    %cst_10 = arith.constant dense<0.000000e+00> : vector<128xf32>
    %17 = vector.multi_reduction <add>, %16, %cst_10 [0] : vector<4x128xf32> to vector<128xf32>
    %18 = vector.shape_cast %17 : vector<128xf32> to vector<1x128xf32>
    %19 = math.log %18 : vector<1x128xf32>
    %20 = arith.addf %13, %19 : vector<1x128xf32>
    %21 = arith.mulf %11, %9 : vector<4x128xf32>
    %cst_11 = arith.constant dense<0.000000e+00> : vector<128xf32>
    %22 = vector.multi_reduction <add>, %21, %cst_11 [0] : vector<4x128xf32> to vector<128xf32>
    %23 = vector.shape_cast %22 : vector<128xf32> to vector<1x128xf32>
    %24 = arith.subf %23, %20 : vector<1x128xf32>
    %c0_12 = arith.constant 0 : index
    %c0_13 = arith.constant 0 : index
    %25 = vector.load %arg6[%c0_12, %c0_13] : memref<1x128xf32, #tpu.memory_space<vmem>>, vector<1x128xf32>
    %cst_14 = arith.constant dense<0.000000e+00> : vector<1xf32>
    %26 = vector.multi_reduction <add>, %24, %cst_14 [1] : vector<1x128xf32> to vector<1xf32>
    %27 = vector.shape_cast %26 : vector<1xf32> to vector<1x1xf32>
    %28 = vector.broadcast %27 : vector<1x1xf32> to vector<1x128xf32>
    %29 = arith.addf %25, %28 : vector<1x128xf32>
    %c0_15 = arith.constant 0 : index
    %c0_16 = arith.constant 0 : index
    %30 = vector.load %arg6[%c0_15, %c0_16] : memref<1x128xf32, #tpu.memory_space<vmem>>, vector<1x128xf32>
    tpu.vector_store %arg6[%c0_15, %c0_16], %29 {strides = array<i32>} : memref<1x128xf32, #tpu.memory_space<vmem>>, vector<1x128xf32>,
    %c1_i32 = arith.constant 1 : i32
    %31 = arith.cmpi eq, %arg2, %c1_i32 : i32
    %32 = arith.extui %31 : i1 to i32
    %c0_i32_17 = arith.constant 0 : i32
    %33 = arith.cmpi ne, %32, %c0_i32_17 : i32
    scf.if %33 {
      %c0_20 = arith.constant 0 : index
      %c0_21 = arith.constant 0 : index
      %39 = vector.load %arg6[%c0_20, %c0_21] : memref<1x128xf32, #tpu.memory_space<vmem>>, vector<1x128xf32>
      %c0_22 = arith.constant 0 : index
      %c0_23 = arith.constant 0 : index
      %40 = vector.load %arg7[%c0_22, %c0_23] : memref<1x128xf32, #tpu.memory_space<vmem>>, vector<1x128xf32>
      %41 = arith.maximumf %40, %39 : vector<1x128xf32>
      %c0_24 = arith.constant 0 : index
      %c0_25 = arith.constant 0 : index
      %42 = vector.load %arg8[%c0_24, %c0_25] : memref<1x128xf32, #tpu.memory_space<vmem>>, vector<1x128xf32>
      %43 = arith.subf %40, %41 : vector<1x128xf32>
      %44 = math.exp %43 : vector<1x128xf32>
      %45 = arith.mulf %42, %44 : vector<1x128xf32>
      %46 = arith.subf %39, %41 : vector<1x128xf32>
      %47 = math.exp %46 : vector<1x128xf32>
      %48 = arith.addf %45, %47 : vector<1x128xf32>
      %c0_26 = arith.constant 0 : index
      %c0_27 = arith.constant 0 : index
      %49 = vector.load %arg8[%c0_26, %c0_27] : memref<1x128xf32, #tpu.memory_space<vmem>>, vector<1x128xf32>
      tpu.vector_store %arg8[%c0_26, %c0_27], %48 {strides = array<i32>} : memref<1x128xf32, #tpu.memory_space<vmem>>, vector<1x128xf32>,
      %c0_28 = arith.constant 0 : index
      %c0_29 = arith.constant 0 : index
      %50 = vector.load %arg7[%c0_28, %c0_29] : memref<1x128xf32, #tpu.memory_space<vmem>>, vector<1x128xf32>
      tpu.vector_store %arg7[%c0_28, %c0_29], %41 {strides = array<i32>} : memref<1x128xf32, #tpu.memory_space<vmem>>, vector<1x128xf32>,
    } else {
    }
    %c7_i32 = arith.constant 7 : i32
    %34 = arith.cmpi eq, %arg1, %c7_i32 : i32
    %c1_i32_18 = arith.constant 1 : i32
    %35 = arith.cmpi eq, %arg2, %c1_i32_18 : i32
    %36 = arith.andi %34, %35 : i1
    %37 = arith.extui %36 : i1 to i32
    %c0_i32_19 = arith.constant 0 : i32
    %38 = arith.cmpi ne, %37, %c0_i32_19 : i32
    scf.if %38 {
      %c0_20 = arith.constant 0 : index
      %c0_21 = arith.constant 0 : index
      %39 = vector.load %arg7[%c0_20, %c0_21] : memref<1x128xf32, #tpu.memory_space<vmem>>, vector<1x128xf32>
      %c0_22 = arith.constant 0 : index
      %c0_23 = arith.constant 0 : index
      %40 = vector.load %arg8[%c0_22, %c0_23] : memref<1x128xf32, #tpu.memory_space<vmem>>, vector<1x128xf32>
      %41 = math.log %40 : vector<1x128xf32>
      %42 = arith.addf %39, %41 : vector<1x128xf32>
      %cst_24 = arith.constant 2.07944155 : f32
      %43 = vector.broadcast %cst_24 : f32 to vector<1x128xf32>
      %44 = arith.subf %42, %43 : vector<1x128xf32>
      %45 = vector.shape_cast %44 : vector<1x128xf32> to vector<1x1x128xf32>
      %c0_25 = arith.constant 0 : index
      %c0_26 = arith.constant 0 : index
      %c0_27 = arith.constant 0 : index
      %46 = vector.load %arg5[%c0_25, %c0_26, %c0_27] : memref<1x1x128xf32, #tpu.memory_space<vmem>>, vector<1x1x128xf32>
      tpu.vector_store %arg5[%c0_25, %c0_26, %c0_27], %45 {strides = array<i32>} : memref<1x1x128xf32, #tpu.memory_space<vmem>>, vector<1x1x128xf32>,
    } else {
    }
    return
  }
  func.func @transform_0(%arg0: i32, %arg1: i32, %arg2: i32) -> (i32, i32, i32, i32) {
    %c0_i32 = arith.constant 0 : i32
    %c0_i32_0 = arith.constant 0 : i32
    return %arg1, %arg0, %c0_i32, %arg2 : i32, i32, i32, i32
  }
  func.func @transform_1(%arg0: i32, %arg1: i32, %arg2: i32) -> (i32, i32, i32) {
    %c0_i32 = arith.constant 0 : i32
    %c0_i32_0 = arith.constant 0 : i32
    return %arg0, %c0_i32, %arg2 : i32, i32, i32
  }
  func.func @transform_2(%arg0: i32, %arg1: i32, %arg2: i32) -> (i32, i32, i32) {
    %c0_i32 = arith.constant 0 : i32
    %c0_i32_0 = arith.constant 0 : i32
    %c0_i32_1 = arith.constant 0 : i32
    return %arg0, %c0_i32, %c0_i32_0 : i32, i32, i32
  }
}

</mosaic_0001>

<bundles_post_ra>
// kernel: tpu_custom_call.1
= control target key start
LH: loop header
LB: loop body
LE: loop exit
PB: predicated region body
PF: predicated region fallthrough
CT: control target
= control target key end

     0   :  { %s1151_s0 = inlined_call_operand.hbm [shape: f32[8,2,4,256], index: 0, kind: input, shape index: {}]   ;;  %s1152_s1 = inlined_call_operand.hbm [shape: f32[2,4,256], index: 1, kind: input, shape index: {}]   ;;  %s1153_s2 = inlined_call_operand.hbm [shape: f32[2,1,128], index: 2, kind: output, shape index: {}]  }
   0x1   :  { %1163 = sst [smem:[#allocation23_spill]] %s1151_s0 }
   0x2   :  { %1164 = sst [smem:[#allocation24_spill]] %s1153_s2 }
   0x3   :  { %7 = vsyncpa [#allocation6], 0 }
   0x4   :  { %9 = vsyncpa [#allocation6 + $0x1], 0 }
   0x5   :  { %10 = vsyncpa [#allocation9], 0 }
   0x6   :  { %12 = vsyncpa [#allocation9 + $0x1], 0 }
   0x7   :  { %13 = vsyncpa [#allocation7], 0 }
   0x8   :  { %15 = vsyncpa [#allocation7 + $0x1], 0  ;;  %s859_s9 = smov 0   ;;  %s861_s10 = smov 0  }
   0x9   :  { %s863_s11 = smov 0   ;;  %s865_s12 = smov 0  }
   0xa   :  { %s867_s13 = smov 0   ;;  %s869_s14 = smov 0  }
   0xb   :  { %s871_s15 = smov 0   ;;  %s873_s16 = smov 0  }
   0xc   :  { %s875_s17 = smov 0   ;;  %s877_s18 = smov 0  }
   0xd   :  { %s879_s19 = smov 0   ;;  %s881_s20 = smov 0  }
   0xe   :  { %s883_s21 = smov 0   ;;  %s885_s22 = smov 0  }
   0xf   :  { %s887_s23 = smov 0   ;;  %s889_s24 = smov 0  }
  0x10 LB: > { %1165 = sst [smem:[#allocation14_spill]] %s779_s9  ;;  %s434_s25 = sadd.s32 4294967295, %s839_s24   ;;  %s839_s24 = sphi %s889_s24, %s21_s24   ;;  %s835_s23 = sphi %s887_s23, %s1195_s23   ;;  %s831_s22 = sphi %s885_s22, %s1208_s22   ;;  %s827_s21 = sphi %s883_s21, %s1207_s21   ;;  %s823_s20 = sphi %s881_s20, %s1192_s20   ;;  %s819_s19 = sphi %s879_s19, %s1206_s19   ;;  %s815_s18 = sphi %s877_s18, %s1205_s18   ;;  %s811_s17 = sphi %s875_s17, %s1204_s17   ;;  %s807_s16 = sphi %s873_s16, %s1203_s16   ;;  %s803_s15 = sphi %s871_s15, %s1202_s15   ;;  %s799_s14 = sphi %s869_s14, %s1201_s14   ;;  %s795_s13 = sphi %s867_s13, %s1200_s13   ;;  %s791_s12 = sphi %s865_s12, %s1199_s12   ;;  %s787_s11 = sphi %s863_s11, %s1198_s11   ;;  %s783_s10 = sphi %s861_s10, %s1197_s10   ;;  %s779_s9 = sphi %s859_s9, %s1196_s9  }
  0x11   : > { %1166 = sst [smem:[#allocation15_spill]] %s811_s17  ;;  %s435_s26 = sadd.s32 4294967294, %s839_s24  }
  0x12   : > { %1167 = sst [smem:[#allocation16_spill]] %s823_s20  ;;  %s33_s27 = sadd.s32 1, %s827_s21 }
  0x13   : > { %1168 = sst [smem:[#allocation17_spill]] %s835_s23  ;;  %s36_s28 = sadd.s32 1, %s831_s22 }
  0x14   : > { %p34_p0 = scmp.ge.s32.totalorder %s33_s27, 2  ;;  %s40_s29 = sadd.s32 1, %s835_s23 }
  0x15   : > { %p58_p1 = scmp.ne.s32.totalorder %s811_s17, %s807_s16  ;;  %p59_p2 = scmp.eq.s32.totalorder %s839_s24, 0 }
  0x16   : > { %s1210_s27 = smov (%p34_p0, %s33_s27), 0  ;;  %s1212_s28 = smov (!%p34_p0, %s36_s28), %s831_s22 }
  0x17   : > { %1169 = sst [smem:[#allocation18_spill]] %s1210_s27  ;;  %s47_s3 = ssub.s32 %s827_s21, %s1210_s27 }
  0x18   : > { %p38_p3 = scmp.ge.s32.totalorder %s1212_s28, 8  ;;  %p64_p4 = scmp.ne.s32.totalorder %s807_s16, %s803_s15 }
  0x19   : > { %p957_p5 = por %p59_p2, %p58_p1  ;;  %p961_p6 = scmp.eq.s32.totalorder %s434_s25, 0 }
  0x1a   : > { %s1214_s28 = smov (%p38_p3, %s1212_s28), 0  ;;  %s1216_s29 = smov (!%p38_p3, %s40_s29), %s835_s23 }
  0x1b   : > { %1172 = sst [smem:[#allocation19_spill]] %s1214_s28  ;;  %s44_s6 = ssub.s32 %s831_s22, %s1214_s28 }
  0x1c   : > { %p972_p7 = por %p961_p6, %p64_p4  ;;  %p42_p8 = scmp.ge.s32.totalorder %s1216_s29, 2 }
  0x1d   : > { %s105_s8 = sadd.s32 1, %s787_s11  ;;  %p115_p9 = scmp.ne.s32.totalorder %s787_s11, %s783_s10 }
  0x1e   : > { %p116_p10 = scmp.eq.s32.totalorder %s434_s25, 31  ;;  %s1218_s29 = smov (%p42_p8, %s1216_s29), 0 }
  0x1f   : > { %1174 = sst [smem:[#allocation20_spill]] %s1218_s29  ;;  %p121_p12 = scmp.ne.s32.totalorder %s783_s10, %s779_s9 }
  0x20   : > { %p981_p11 = por %p116_p10, %p115_p9  ;;  %s45_s30 = ssub.s32 %s835_s23, %s1218_s29 }
  0x21   : > { %p122_p13 = scmp.eq.s32.totalorder %s435_s26, 31  ;;  %s46_s28 = sor.u32 %s45_s30, %s44_s6 }
  0x22   : > { %s1175_s15 = scalar_select %p981_p11, 1, 0 }
  0x23   : > { %s76_s27 = sor.u32 %s47_s3, %s45_s30  ;;  %s48_s2 = sor.u32 %s47_s3, %s46_s28 }
  0x24   : > { %1176 = sst [smem:[#allocation21_spill]] %s1175_s15  ;;  %p989_p0 = scmp.eq.s32.totalorder %s76_s27, 0 }
  0x25   : > { %p49_p1 = scmp.eq.s32.totalorder %s48_s2, 0  ;;  %p103_p3 = scmp.eq.s32.totalorder %s45_s30, 0 }
  0x26   : > { %p993_p4 = por %p122_p13, %p121_p12  ;;  %s1179_s9 = sadd.s32 1, %s811_s17 }
  0x27   : > { %s1000_s15 = scalar_select %p49_p1, %s811_s17, %s1179_s9  }
  0x28   : > { %s1178_s25 = scalar_select %p993_p4, 1, 0 }
  0x29   : > { %1180 = sst [smem:[#allocation22_spill]] %s1000_s15  ;;  %p470_p8 = scmp.lt.s32.totalorder %s839_s24, 32 }
  0x2a   : > { %s1003_s26 = scalar_select %p103_p3, %s787_s11, %s105_s8  }
  0x2b   : > { %s142_s28 = sand.u32 1, %s811_s17   ;;  %s439_s3 = sshll.u32 %s835_s23, 1 }
  0x2c   : > { %s438_s27 = sshll.u32 %s142_s28, 2  ;;  %s150_s6 = sadd.s32 %s827_s21, %s439_s3 }
  0x2d   : > { %s440_s2 = sshll.u32 %s831_s22, 2  ;;  %s146_s29 = scalar_lea.vmem [#allocation5], %s438_s27 }
  0x2e   : > { %s152_s30 = sadd.s32 %s440_s2, %s150_s6  ;;  %s158_s9 = sshll.u32 %s146_s29, 4  ;;  %s159_s9 = int_to_ptr.vmem [resolvable:$true] %s158_s9 }
  0x2f   : > { %s441_s8 = sshll.u32 %s152_s30, 2  ;;  %s1181_s0 = sld [smem:[#allocation23_spill]] }
  0x30   : > { %p460_p9 = pnand %p470_p8, %p957_p5  ;;  %p445_p10 = scmp.ge.s32.totalorder %s839_s24, 1 }
  0x31   : > { %s143_s2 = scalar_lea.sflag [#allocation6], %s142_s28  ;;  %p184_p12 = scmp.lt.s32.totalorder %s839_s24, 33 }
  0x32   : > { %s79_s27 = sadd.s32 1, %s799_s14  ;;  %p86_p1 = scmp.ne.s32.totalorder %s799_s14, %s795_s13 }
  0x33   : > { %p1019_p13 = pnand %p445_p10, %p184_p12  ;;  %p92_p4 = scmp.ne.s32.totalorder %s795_s13, %s791_s12 }
  0x34   : > { %s1029_s17 = scalar_select %p989_p0, %s799_s14, %s79_s27  }
  0x35   : > { %s154_s23 = scalar_lea.hbm %s1181_s0, %s441_s8  ;;  %p88_p3 = por %p86_p1, %p59_p2 }
  0x36   : > { %s156_s3 = sshll.u32 %s154_s23, 4  ;;  %s165_s4 = sand.u32 1, %s799_s14   ;;  %s157_s3 = int_to_ptr.hbm [resolvable:$true] %s156_s3 }
  0x37   : > { %462 = dma.hbm_to_vmem [thread:$0]  (!%p460_p9), %s157_s3, 64, %s159_s9, %s143_s2  }
  0x38   : > { %s444_s23 = sshll.u32 %s150_s6, 2  ;;  %p1038_p5 = por %p92_p4, %p961_p6 }
  0x39   : > { %s442_s28 = sshll.u32 %s165_s4, 2  ;;  %s175_s8 = scalar_lea.hbm %s1152_s1, %s444_s23 }
  0x3a   : > { %s177_s3 = sshll.u32 %s175_s8, 4  ;;  %s169_s20 = scalar_lea.vmem [#allocation8], %s442_s28  ;;  %s178_s3 = int_to_ptr.hbm [resolvable:$true] %s177_s3 }
  0x3b   : > { %s179_s2 = sshll.u32 %s169_s20, 4  ;;  %p463_p2 = pnand %p470_p8, %p88_p3  ;;  %s180_s2 = int_to_ptr.vmem [resolvable:$true] %s179_s2 }
  0x3c   : > { %s166_s12 = scalar_lea.sflag [#allocation9], %s165_s4  ;;  %188 = sbr.rel (%p1019_p13) target bundleno = 332 (0x14c), region = 28 }
  0x3d   : > { %465 = dma.hbm_to_vmem [thread:$0]  (!%p463_p2), %s178_s3, 64, %s180_s2, %s166_s12  }
  0x3e   : > { %s190_s5 = sand.u32 (!%p1019_p13), 1, %s807_s16  }
  0x3f   : > { %s446_s6 = sshll.u32 (!%p1019_p13), %s190_s5, 2  ;;  %s191_s27 = scalar_lea.sflag (!%p1019_p13), [#allocation6], %s190_s5 }
  0x40   : > { %s194_s0 = scalar_lea.vmem (!%p1019_p13), [#allocation5], %s446_s6 }
  0x41   : > { %766 = dma.done.wait (%p972_p7), %s191_s27, 64  }
  0x42   : > { %768 = vsyncadd (%p972_p7), %s191_s27, 4294967232  ;;  %s200_s23 = sand.u32 1, %s795_s13  }
  0x43   : > { %s1055_s28 = sshll.u32 %s200_s23, 2  ;;  %s201_s4 = scalar_lea.sflag [#allocation9], %s200_s23 }
  0x44   : > { %s204_s29 = scalar_lea.vmem [#allocation8], %s1055_s28 }
  0x45   : > { %770 = dma.done.wait (%p1038_p5), %s201_s4, 64  }
  0x46   : > { %772 = vsyncadd (%p1038_p5), %s201_s4, 4294967232  ;;  %s228_s30 = sand.u32 1, %s783_s10   ;;  %p230_p6 = scmp.eq.s32.totalorder %s819_s19, 0 }
  0x47   : > { %p231_p7 = scmp.eq.s32.totalorder %s815_s18, 0  ;;  %s1067_s7 = scalar_lea.vmem [#allocation10], %s228_s30 }
  0x49   : > { %p232_p0 = pnand %p231_p7, %p230_p6 }
  0x4b   : > { %235 = sbr.rel (%p232_p0) target bundleno = 83 (0x53), region = 40 }
  0x50   : > { %v841_v0 = vmov -1e+30   ;;  %v842_v1 = vmov 0.0  }
  0x51   : > { %236 = vst [vmem:[#allocation3] sm:$0x1] %v841_v0 }
  0x52   : > { %237 = vst [vmem:[#allocation4] sm:$0x1] %v842_v1 }
  0x53 PF: > { %p448_p4 = scmp.ne.s32.totalorder %s815_s18, 0 }
  0x55   : > { %240 = sbr.rel (%p448_p4) target bundleno = 92 (0x5c), region = 44 }
  0x5a   : > { %v843_v2 = vmov 0.0  }
  0x5b   : > { %241 = vst [vmem:[#allocation2] sm:$0x1] %v843_v2 }
  0x5c PF: > { %v242_v3 = vld [vmem:[%s194_s0] sm:$0xf]  ;;  %vm244_vm0 = vcmask 1043456   ;;  %v243_v12 = vld [vmem:[%s204_s29] sm:$0xf]  ;;  %p279_p8 = scmp.eq.s32.totalorder %s815_s18, 1 }
  0x5d   : > { %v245_v4 = vsel %vm244_vm0, %v242_v3, -inf  ;;  %v265_v14 = vmul.f32 %v243_v12, %v242_v3  ;;  %p449_p9 = scmp.ne.s32.totalorder %s815_s18, 1 }
  0x5e   : > { %v246_v5 = vrot.slane %v245_v4, 4 }
  0x5f   : > { %v266_v15 = vsel %vm244_vm0, %v265_v14, 0.0 }
  0x60   : > { %v247_v6 = vmax.f32 %v245_v4, %v246_v5  ;;  %v267_v18 = vrot.slane %v266_v15, 4 }
  0x62   : > { %v248_v7 = vrot.slane %v247_v6, 2  ;;  %v268_v21 = vadd.f32 %v267_v18, %v266_v15  ;;  %v274_v34 = vld [vmem:[#allocation2] sm:$0x1] }
  0x64   : > { %v249_v8 = vmax.f32 %v247_v6, %v248_v7  ;;  %v269_v24 = vrot.slane %v268_v21, 2 }
  0x66   : > { %v250_v9 = vrot.slane %v249_v8, 1  ;;  %v270_v27 = vadd.f32 %v269_v24, %v268_v21 }
  0x68   : > { %v251_v10 = vmax.f32 %v249_v8, %v250_v9  ;;  %v271_v28 = vrot.slane %v270_v27, 1 }
  0x6a   : > { %v252_v11 = vsub.f32 %v242_v3, %v251_v10  ;;  %v272_v31 = vadd.f32 %v271_v28, %v270_v27 }
  0x6c   : > { %v253_v13 = vmul.f32 1.442695, %v252_v11 }
  0x6e   : > { %603 = vpow2.f32 %v253_v13 }
  0x74   : > { %v604_v16 = vpop.eup %603 }
  0x75   : > { %v255_v17 = vsel %vm244_vm0, %v604_v16, 0.0 }
  0x76   : > { %v256_v19 = vrot.slane %v255_v17, 4 }
  0x78   : > { %v257_v20 = vadd.f32 %v256_v19, %v255_v17 }
  0x7a   : > { %v258_v22 = vrot.slane %v257_v20, 2 }
  0x7c   : > { %v259_v23 = vadd.f32 %v258_v22, %v257_v20 }
  0x7e   : > { %v260_v25 = vrot.slane %v259_v23, 1 }
  0x80   : > { %v261_v26 = vadd.f32 %v260_v25, %v259_v23 }
  0x82   : > { %605 = vlog2.f32 %v261_v26 }
  0x88   : > { %v606_v29 = vpop.eup %605 }
  0x89   : > { %v263_v30 = vmul.f32 0.6931472, %v606_v29 }
  0x8b   : > { %v264_v32 = vadd.f32 %v263_v30, %v251_v10 }
  0x8d   : > { %v273_v33 = vsub.f32 %v272_v31, %v264_v32 }
  0x8f   : > { %275 = vadd.xlane.f32.xlu0 %v273_v33 }
 0x101   : > { %282 = sbr.rel (%p449_p9) target bundleno = 287 (0x11f), region = 48 }
 0x102   : > { %v276_v35 = vpop.xlane.xlu0 %275 }
 0x103   : > { %v277_v36 = vadd.f32 %v276_v35, %v274_v34 }
 0x105   : > { %278 = vst [vmem:[#allocation2] sm:$0x1] %v277_v36 }
 0x106   : > { %v284_v38 = vld [vmem:[#allocation3] sm:$0x1]  ;;  %v286_v44 = vld [vmem:[#allocation4] sm:$0x1] }
 0x10c   : > { %v283_v37 = vld [vmem:[#allocation2] sm:$0x1] }
 0x10d   : > { %v285_v39 = vmax.f32 %v284_v38, %v283_v37 }
 0x10f   : > { %v287_v40 = vsub.f32 %v284_v38, %v285_v39  ;;  %v291_v41 = vsub.f32 %v283_v37, %v285_v39  ;;  %296 = vst [vmem:[#allocation3] sm:$0x1] %v285_v39 }
 0x111   : > { %v288_v42 = vmul.f32 1.442695, %v287_v40  ;;  %v292_v43 = vmul.f32 1.442695, %v291_v41 }
 0x113   : > { %607 = vpow2.f32 %v288_v42 }
 0x114   : > { %609 = vpow2.f32 %v292_v43 }
 0x119   : > { %v608_v45 = vpop.eup %607 }
 0x11a   : > { %v610_v46 = vpop.eup %609  ;;  %v290_v47 = vmul.f32 %v608_v45, %v286_v44 }
 0x11c   : > { %v294_v48 = vadd.f32 %v610_v46, %v290_v47 }
 0x11e   : > { %295 = vst [vmem:[#allocation4] sm:$0x1] %v294_v48 }
 0x11f PF: > { %p297_p10 = scmp.eq.s32.totalorder %s819_s19, 7 }
 0x121   : > { %p298_p12 = pnand %p297_p10, %p279_p8 }
 0x123   : > { %301 = sbr.rel (%p298_p12) target bundleno = 311 (0x137), region = 52 }
 0x128   : > { %v303_v49 = vld [vmem:[#allocation4] sm:$0x1]  ;;  %v302_v51 = vld [vmem:[#allocation3] sm:$0x1] }
 0x129   : > { %611 = vlog2.f32 %v303_v49 }
 0x12f   : > { %v612_v50 = vpop.eup %611 }
 0x130   : > { %v305_v52 = vmul.f32 0.6931472, %v612_v50 }
 0x132   : > { %v306_v53 = vadd.f32 %v305_v52, %v302_v51 }
 0x134   : > { %v450_v54 = vadd.f32 -2.0794415, %v306_v53 }
 0x136   : > { %308 = vst [vmem:[%s1067_s7] sm:$0x1] %v450_v54 }
 0x137 PF: > { %s1184_s0 = sld [smem:[#allocation16_spill]]  ;;  %s320_s3 = sshll.u32 %s1067_s7, 4  ;;  %s321_s3 = int_to_ptr.vmem [resolvable:$true] %s320_s3 }
 0x138   : > { %s1185_s8 = sld [smem:[#allocation24_spill]]  ;;  %s310_s2 = scalar_lea.sflag [#allocation7], %s228_s30 }
 0x13e   : > { %s318_s18 = scalar_lea.hbm %s1185_s8, %s1184_s0  ;;  %s693_s23 = scalar_lea.hbm %s1185_s8, 2 }
 0x13f   : > { %s322_s20 = sshll.u32 %s318_s18, 4  ;;  %s323_s20 = int_to_ptr.hbm [resolvable:$true] %s322_s20 }
 0x140   : > { %s687_s12 = sshra.s32 %s323_s20, 4  ;;  %s688_s12 = int_to_ptr.hbm [resolvable:$true] %s687_s12 }
 0x141   : > { %s689_s5 = scalar_lea.hbm %s688_s12, 1  ;;  %p694_p5 = scmp.lt.s32.totalorder %s688_s12, %s1185_s8 }
 0x142   : > { %p690_p13 = scmp.ne.s32.totalorder %s688_s12, %s689_s5  ;;  %p695_p2 = scmp.lt.s32.totalorder %s693_s23, %s689_s5 }
 0x144   : > { %p691_p1 = pnand %p690_p13, %p981_p11  ;;  %p696_p6 = por %p695_p2, %p694_p5 }
 0x146   : > { %p692_p3 = pneg %p691_p1 }
 0x148   : > { %p697_p7 = pnand %p696_p6, %p692_p3 }
 0x14a   : > { %700 = shalt.err (!%p697_p7)
}
 0x14b   : > { %457 = dma.vmem_to_hbm [thread:$0]  (%p981_p11), %s321_s3, 16, %s323_s20, %s310_s2  }
 0x14c PF: > { %s1187_s29 = sld [smem:[#allocation14_spill]]  ;;  %p471_p0 = scmp.ge.s32.totalorder %s839_s24, 2 }
 0x14d   : > { %p1188_p4 = scmp.ne.s32.totalorder %s1178_s25, 0 }
 0x14f   : > { %p467_p8 = pnand %p471_p0, %p1188_p4 }
 0x151   : > { %p468_p9 = pneg %p467_p8 }
 0x152   : > { %s334_s30 = sand.u32 1, %s1187_s29  }
 0x153   : > { %s335_s7 = scalar_lea.sflag [#allocation7], %s334_s30 }
 0x154   : > { %774 = dma.done.wait (%p468_p9), %s335_s7, 16  }
 0x155   : > { %776 = vsyncadd (%p468_p9), %s335_s7, 4294967280  ;;  %s21_s24 = sadd.s32 1, %s839_s24   ;;  %s1190_s19 = sld [smem:[#allocation15_spill]] }
 0x156   : > { %p1098_p10 = scmp.ge.s32.totalorder %s21_s24, 34   ;;  %s1191_s25 = sld [smem:[#allocation22_spill]] }
 0x157   : > { %s1192_s20 = sld [smem:[#allocation17_spill]]  ;;  %s1196_s9 = smov %s783_s10 }
 0x158   : > { %s1193_s3 = sld [smem:[#allocation18_spill]]  ;;  %s1197_s10 = smov %s787_s11 }
 0x159   : > { %s1194_s2 = sld [smem:[#allocation19_spill]]  ;;  %s1198_s11 = smov %s1003_s26 }
 0x15a   : > { %s1195_s23 = sld [smem:[#allocation20_spill]]  ;;  %s1199_s12 = smov %s795_s13 }
 0x15b   : > { %s1200_s13 = smov %s799_s14  ;;  %s1201_s14 = smov %s1029_s17 }
 0x15c   : > { %s1202_s15 = smov %s807_s16  ;;  %s1203_s16 = smov %s1190_s19 }
 0x15d   : > { %s1204_s17 = smov %s1191_s25  ;;  %s1205_s18 = smov %s827_s21 }
 0x15e   : > { %s1206_s19 = smov %s831_s22  ;;  %s1207_s21 = smov %s1193_s3 }
 0x15f   : > { %s1208_s22 = smov %s1194_s2  ;;  %20 = sbr.rel (!%p1098_p10) target bundleno = 16 (0x10), region = 102 }
 0x164   :  { %340 = vsyncpa [#allocation6], 1 }
 0x165   :  { %342 = vsyncpa [#allocation6 + $0x1], 1 }
 0x166   :  { %343 = vsyncpa [#allocation9], 1 }
 0x167   :  { %345 = vsyncpa [#allocation9 + $0x1], 1 }
 0x168   :  { %346 = vsyncpa [#allocation7], 1 }
 0x169   :  { %348 = vsyncpa [#allocation7 + $0x1], 1 }

</bundles_post_ra>
